<compile_context>
chip_gen: v5e
topology: v5e:2x2
jax: 0.10.0
libtpu: 0.0.40
codegen_flags: <defaults>
</compile_context>

<pallas_src>
import jax
import jax.numpy as jnp
from jax.experimental import pallas as pl
from jax.experimental.pallas import tpu as pltpu

_LANE = 128
_TINY_BYTES = 2 * 1024 * 1024          # single whole-array block below this
_MAX_FOOTPRINT = 32 * 1024 * 1024      # cap on double-buffered in+out bytes


def _round_up(n: int, m: int) -> int:
    return ((n + m - 1) // m) * m


def _sublane_multiple(itemsize: int) -> int:
    # f32 -> 8, bf16 -> 16, int8/fp8 -> 32 sublanes per packed vreg row-group.
    return max(8, 32 // max(1, int(itemsize)))


def _vmem_capacity_bytes() -> int:
    try:
        return int(pltpu.get_tpu_info().vmem_capacity_bytes)
    except Exception:
        return 64 * 1024 * 1024  # conservative fallback (v7x per-TC VMEM)


def _footprint_budget_bytes() -> int:
    # Budget for double-buffered input + output (4 x tile bytes).
    # 128 MiB parts (v5e/v6e) -> 32 MiB; 64 MiB-per-TC v7x -> 16 MiB.
    cap = _vmem_capacity_bytes()
    return max(4 * 1024 * 1024, min(cap // 4, _MAX_FOOTPRINT))


def _toynet_kernel(params_ref, x_ref, o_ref):
    # params_ref: SMEM (4,) f32 -> [a, b, c, d]
    x = x_ref[...]
    if jnp.dtype(x.dtype) in (jnp.dtype(jnp.float32), jnp.dtype(jnp.bfloat16)):
        cdt = x.dtype            # native f32 / bf16 Horner (no cast round trip)
    else:
        # TODO(synk): int / low-precision inputs are computed in f32 and cast
        # back (matches float math, not integer overflow semantics).
        cdt = jnp.float32
    a = params_ref[0].astype(cdt)
    b = params_ref[1].astype(cdt)
    c = params_ref[2].astype(cdt)
    d = params_ref[3].astype(cdt)
    xv = x.astype(cdt)
    # Horner form of a + b*x + c*x^2 + d*x^3.
    y = a + xv * (b + xv * (c + xv * d))
    o_ref[...] = y.astype(o_ref.dtype)


def _choose_tiles(R: int, C: int, itemsize: int, budget: int):
    """Pick (tile_r, tile_c): full row width if it fits, otherwise tile cols."""
    sub = _sublane_multiple(itemsize)

    def footprint(tr, tc):
        return 4 * tr * tc * itemsize  # 2x double-buffered input + output

    # Preferred: full-row-width tiles (contiguous DMA, wide unmasked stores).
    if footprint(min(R, sub), C) <= budget:
        if footprint(R, C) <= budget:
            return R, C                       # whole array in one block
        max_rows = budget // (4 * C * itemsize)
        tile_r = max(sub, (max_rows // sub) * sub)   # multiple of 8 sublanes
        return min(tile_r, R), C

    # Very wide rows: tile along columns too (rare path).
    tile_r = min(R, sub)
    max_cols = budget // (4 * tile_r * itemsize)
    if max_cols >= C:
        tile_c = C
    else:
        tile_c = max(_LANE, (max_cols // _LANE) * _LANE)  # multiple of 128
    return tile_r, tile_c


def _run_whole(params, x):
    """Tiny inputs: single whole-array block, no grid, no alignment constraint."""
    return pl.pallas_call(
        _toynet_kernel,
        out_shape=jax.ShapeDtypeStruct(x.shape, x.dtype),
        in_specs=[
            pl.BlockSpec(memory_space=pltpu.MemorySpace.SMEM),
            pl.BlockSpec(memory_space=pltpu.MemorySpace.VMEM),
        ],
        out_specs=pl.BlockSpec(memory_space=pltpu.MemorySpace.VMEM),
    )(params, x)


def _run_tiled(params, x2d):
    """Streaming path over a 2-D slab; ragged edges handled by masked blocks."""
    R, C = x2d.shape
    itemsize = jnp.dtype(x2d.dtype).itemsize
    budget = _footprint_budget_bytes()
    tile_r, tile_c = _choose_tiles(R, C, itemsize, budget)
    grid = (pl.cdiv(R, tile_r), pl.cdiv(C, tile_c))

    footprint = 4 * tile_r * tile_c * itemsize
    vmem_limit = int(min(_vmem_capacity_bytes() * 3 // 4,
                         max(16 * 1024 * 1024, 2 * footprint)))

    return pl.pallas_call(
        _toynet_kernel,
        out_shape=jax.ShapeDtypeStruct((R, C), x2d.dtype),
        grid=grid,
        in_specs=[
            # Scalars a,b,c,d: whole (4,) array in SMEM, same for every step.
            pl.BlockSpec(memory_space=pltpu.MemorySpace.SMEM),
            # Default double-buffering; bump to pipeline_mode=pl.Buffered(3)
            # only if a profile shows exposed DMA at step boundaries.
            pl.BlockSpec((tile_r, tile_c), lambda i, j: (i, j)),
        ],
        out_specs=pl.BlockSpec((tile_r, tile_c), lambda i, j: (i, j)),
        compiler_params=pltpu.CompilerParams(
            dimension_semantics=("parallel", "parallel"),
            vmem_limit_bytes=vmem_limit,
        ),
    )(params, x2d)


def toynet_forward(params, x):
    """params: (4,) f32 array [a, b, c, d]; x: array of any shape."""
    orig_shape = x.shape
    n = x.size
    if n == 0:
        return x
    itemsize = jnp.dtype(x.dtype).itemsize

    # Tiny input: single whole-array block (no grid-step overhead, no padding).
    if n * itemsize <= _TINY_BYTES:
        return _run_whole(params, x)

    # Already a lane-dense 2-D slab: run in place (full-width blocks have no
    # 128-divisibility requirement, so no padding is ever needed).
    if x.ndim == 2 and x.shape[1] >= 512:
        return _run_tiled(params, x)

    # Narrow / non-2-D input (e.g. (N,1) or (N,)): flatten (metadata-only) and
    # view as a (rows, W) slab with W a large multiple of 128 dividing N, so
    # the reshape is copy-free and stores are wide unmasked vst.
    flat = x.reshape(-1)
    for w in (8192, 4096, 2048, 1024, 512, 256, 128):
        if n % w == 0:
            out = _run_tiled(params, flat.reshape(n // w, w))
            return out.reshape(orig_shape)

    # Rare fallback (total size not a multiple of 128): one pad + slice copy.
    w = 1024
    n_pad = _round_up(n, w)
    flat_p = jnp.pad(flat, (0, n_pad - n))
    out = _run_tiled(params, flat_p.reshape(n_pad // w, w))
    return out.reshape(-1)[:n].reshape(orig_shape)


if __name__ == "__main__":
    key = jax.random.PRNGKey(0)
    k_a, k_b, k_c, k_d, k1, k2, k3, k4 = jax.random.split(key, 8)

    # Deterministic "torch.randn(())" scalar parameters packed as a (4,) vector.
    a = jax.random.normal(k_a, (), dtype=jnp.float32)
    b = jax.random.normal(k_b, (), dtype=jnp.float32)
    c = jax.random.normal(k_c, (), dtype=jnp.float32)
    d = jax.random.normal(k_d, (), dtype=jnp.float32)
    params = jnp.stack([a, b, c, d])

    def ref_fn(x):
        return a + b * x + c * x ** 2 + d * x ** 3

    fwd = jax.jit(toynet_forward)

    # 1) Typical ToyNet input (N, 1): tiny whole-array path.
    x_narrow = jax.random.normal(k1, (512, 1), dtype=jnp.float32)
    out = jax.block_until_ready(fwd(params, x_narrow))
    assert out.shape == x_narrow.shape and out.dtype == x_narrow.dtype
    assert jnp.allclose(out, ref_fn(x_narrow), atol=2e-4, rtol=1e-5)

    # 2) Arbitrary-rank small input: tiny whole-array path, no reshaping needed.
    x_4d = jax.random.normal(k2, (2, 4, 16, 16), dtype=jnp.float32)
    out = jax.block_until_ready(fwd(params, x_4d))
    assert out.shape == x_4d.shape
    assert jnp.allclose(out, ref_fn(x_4d), atol=2e-4, rtol=1e-5)

    # 3) 2-D streaming path with ragged rows: full-width tiles, pl.cdiv grid,
    #    masked edge block (no jnp.pad / slice round trip).
    x_2d = jax.random.normal(k3, (2056, 1024), dtype=jnp.float32)
    out = jax.block_until_ready(fwd(params, x_2d))
    assert out.shape == x_2d.shape and out.dtype == x_2d.dtype
    assert jnp.allclose(out, ref_fn(x_2d), atol=2e-4, rtol=1e-5)

    # 4) Large narrow input: copy-free flatten -> (rows, 8192) lane-dense slab.
    x_flat = jax.random.normal(k4, (786432, 1), dtype=jnp.float32)
    out = jax.block_until_ready(fwd(params, x_flat))
    assert out.shape == x_flat.shape and out.dtype == x_flat.dtype
    assert jnp.allclose(out, ref_fn(x_flat), atol=2e-4, rtol=1e-5)

    print("KERNEL_OK")
</pallas_src>

<mosaic_0001>
module attributes {stable_mosaic.version = 11 : i64} {
  func.func @_toynet_kernel(%arg0: memref<4xf32, #tpu.memory_space<smem>>, %arg1: memref<512x1xf32, #tpu.memory_space<vmem>>, %arg2: memref<512x1xf32, #tpu.memory_space<vmem>>) attributes {dimension_semantics = [], scalar_prefetch = 0 : i64, scratch_operands = 0 : i64, tpu.core_type = #tpu.core_type<tc>} {
    %c0 = arith.constant 0 : index
    %c0_0 = arith.constant 0 : index
    %0 = vector.load %arg1[%c0, %c0_0] : memref<512x1xf32, #tpu.memory_space<vmem>>, vector<512x1xf32>
    %c0_1 = arith.constant 0 : index
    %1 = memref.load %arg0[%c0_1] : memref<4xf32, #tpu.memory_space<smem>>
    %c1 = arith.constant 1 : index
    %2 = memref.load %arg0[%c1] : memref<4xf32, #tpu.memory_space<smem>>
    %c2 = arith.constant 2 : index
    %3 = memref.load %arg0[%c2] : memref<4xf32, #tpu.memory_space<smem>>
    %c3 = arith.constant 3 : index
    %4 = memref.load %arg0[%c3] : memref<4xf32, #tpu.memory_space<smem>>
    %5 = vector.broadcast %4 : f32 to vector<512x1xf32>
    %6 = arith.mulf %0, %5 : vector<512x1xf32>
    %7 = vector.broadcast %3 : f32 to vector<512x1xf32>
    %8 = arith.addf %7, %6 : vector<512x1xf32>
    %9 = arith.mulf %0, %8 : vector<512x1xf32>
    %10 = vector.broadcast %2 : f32 to vector<512x1xf32>
    %11 = arith.addf %10, %9 : vector<512x1xf32>
    %12 = arith.mulf %0, %11 : vector<512x1xf32>
    %13 = vector.broadcast %1 : f32 to vector<512x1xf32>
    %14 = arith.addf %13, %12 : vector<512x1xf32>
    %c0_2 = arith.constant 0 : index
    %c0_3 = arith.constant 0 : index
    %15 = vector.load %arg2[%c0_2, %c0_3] : memref<512x1xf32, #tpu.memory_space<vmem>>, vector<512x1xf32>
    tpu.vector_store %arg2[%c0_2, %c0_3], %14 {strides = array<i32>} : memref<512x1xf32, #tpu.memory_space<vmem>>, vector<512x1xf32>,
    return
  }
}

</mosaic_0001>

<bundles_post_ra>
// kernel: toynet_forward.1
= control target key start
LH: loop header
LB: loop body
LE: loop exit
PB: predicated region body
PF: predicated region fallthrough
CT: control target
= control target key end

     0   :  { %7 = vsyncpa [#allocation3], 0  ;;  %s568_s12 = smov [#allocation2]   ;;  %s1299_s0 = inlined_call_operand.vmem [shape: f32[4], index: 0, kind: input, shape index: {}]   ;;  %s1300_s1 = inlined_call_operand.vmem [shape: f32[512,1], index: 1, kind: input, shape index: {}]   ;;  %s1301_s2 = inlined_call_operand.vmem [shape: f32[512,1], index: 2, kind: output, shape index: {}]  }
   0x1   :  { %s13_s11 = sshll.u32 %s1299_s0, 4  ;;  %s14_s11 = int_to_ptr.vmem [resolvable:$true] %s13_s11 }
   0x2   :  { %16 = dma.vmem_to_smem %s14_s11, 16, %s568_s12, [#allocation3]  }
   0x3   :  { %566 = dma.done.wait [#allocation3], 16  }
   0x4   :  { %567 = vsyncadd [#allocation3], 4294967280 }
   0x5   :  { %23 = sfence }
   0x6   :  { %s88_s13 = sld [smem:[#allocation2]]  ;;  %v24_v0 = vld [vmem:[%s1300_s1] sm:$0xff]  ;;  %v25_v1 = vld [vmem:[%s1300_s1 + $0x8] sm:$0xff]  ;;  %v26_v2 = vld [vmem:[%s1300_s1 + $0x10] sm:$0xff]  ;;  %vm480_vm0 = vcmask 7168  }
   0x7   :  { %s550_s14 = sld [smem:[#allocation2 + $0x1]]  ;;  %v27_v3 = vld [vmem:[%s1300_s1 + $0x18] sm:$0xff]  ;;  %v28_v4 = vld [vmem:[%s1300_s1 + $0x20] sm:$0xff]  ;;  %v29_v5 = vld [vmem:[%s1300_s1 + $0x28] sm:$0xff] }
   0x8   :  { %s551_s15 = sld [smem:[#allocation2 + $0x2]]  ;;  %v30_v6 = vld [vmem:[%s1300_s1 + $0x30] sm:$0xff]  ;;  %v31_v7 = vld [vmem:[%s1300_s1 + $0x38] sm:$0xff]  ;;  %v32_v48 = vld [vmem:[%s1300_s1 + $0x40] sm:$0xff] }
   0x9   :  { %s552_s16 = sld [smem:[#allocation2 + $0x3]]  ;;  %v33_v49 = vld [vmem:[%s1300_s1 + $0x48] sm:$0xff]  ;;  %v34_v54 = vld [vmem:[%s1300_s1 + $0x50] sm:$0xff]  ;;  %v35_v55 = vld [vmem:[%s1300_s1 + $0x58] sm:$0xff] }
   0xa   :  { %v36_v56 = vld [vmem:[%s1300_s1 + $0x60] sm:$0xff]  ;;  %v37_v61 = vld [vmem:[%s1300_s1 + $0x68] sm:$0xff]  ;;  %v38_v62 = vld [vmem:[%s1300_s1 + $0x70] sm:$0xff] }
   0xb   :  { %v39_v63 = vld [vmem:[%s1300_s1 + $0x78] sm:$0xff] }
   0xc   :  { %v617_v11 = vstv %s88_s13 }
   0xd   :  { %v615_v10 = vstv %s550_s14 }
   0xe   :  { %v613_v9 = vstv %s551_s15 }
   0xf   :  { %v611_v8 = vstv %s552_s16 }
  0x10   :  { %v93_v12 = vmul.f32 %v611_v8, %v24_v0  ;;  %v94_v13 = vmul.f32 %v611_v8, %v25_v1  ;;  %v95_v14 = vmul.f32 %v611_v8, %v26_v2  ;;  %v96_v15 = vmul.f32 %v611_v8, %v27_v3 }
  0x11   :  { %v97_v16 = vmul.f32 %v611_v8, %v28_v4  ;;  %v98_v17 = vmul.f32 %v611_v8, %v29_v5  ;;  %v99_v18 = vmul.f32 %v611_v8, %v30_v6  ;;  %v100_v19 = vmul.f32 %v611_v8, %v31_v7 }
  0x12   :  { %v158_v20 = vadd.f32 %v613_v9, %v93_v12  ;;  %v159_v21 = vadd.f32 %v613_v9, %v94_v13  ;;  %v160_v22 = vadd.f32 %v613_v9, %v95_v14  ;;  %v161_v23 = vadd.f32 %v613_v9, %v96_v15 }
  0x13   :  { %v162_v24 = vadd.f32 %v613_v9, %v97_v16  ;;  %v163_v25 = vadd.f32 %v613_v9, %v98_v17  ;;  %v164_v26 = vadd.f32 %v613_v9, %v99_v18  ;;  %v165_v27 = vadd.f32 %v613_v9, %v100_v19 }
  0x14   :  { %v222_v28 = vmul.f32 %v158_v20, %v24_v0  ;;  %v223_v29 = vmul.f32 %v159_v21, %v25_v1  ;;  %v224_v30 = vmul.f32 %v160_v22, %v26_v2  ;;  %v225_v31 = vmul.f32 %v161_v23, %v27_v3 }
  0x15   :  { %v226_v32 = vmul.f32 %v162_v24, %v28_v4  ;;  %v227_v33 = vmul.f32 %v163_v25, %v29_v5  ;;  %v228_v34 = vmul.f32 %v164_v26, %v30_v6  ;;  %v229_v35 = vmul.f32 %v165_v27, %v31_v7 }
  0x16   :  { %v287_v36 = vadd.f32 %v615_v10, %v222_v28  ;;  %v288_v37 = vadd.f32 %v615_v10, %v223_v29  ;;  %v289_v38 = vadd.f32 %v615_v10, %v224_v30  ;;  %v290_v39 = vadd.f32 %v615_v10, %v225_v31 }
  0x17   :  { %v291_v40 = vadd.f32 %v615_v10, %v226_v32  ;;  %v292_v41 = vadd.f32 %v615_v10, %v227_v33  ;;  %v293_v42 = vadd.f32 %v615_v10, %v228_v34  ;;  %v294_v43 = vadd.f32 %v615_v10, %v229_v35 }
  0x18   :  { %v351_v44 = vmul.f32 %v287_v36, %v24_v0  ;;  %v352_v45 = vmul.f32 %v288_v37, %v25_v1  ;;  %v353_v46 = vmul.f32 %v289_v38, %v26_v2  ;;  %v354_v47 = vmul.f32 %v290_v39, %v27_v3 }
  0x19   :  { %v355_v50 = vmul.f32 %v291_v40, %v28_v4  ;;  %v356_v51 = vmul.f32 %v292_v41, %v29_v5  ;;  %v357_v52 = vmul.f32 %v293_v42, %v30_v6  ;;  %v358_v53 = vmul.f32 %v294_v43, %v31_v7 }
  0x1a   :  { %v416_v57 = vadd.f32 %v617_v11, %v351_v44  ;;  %v417_v58 = vadd.f32 %v617_v11, %v352_v45  ;;  %v418_v59 = vadd.f32 %v617_v11, %v353_v46  ;;  %v419_v60 = vadd.f32 %v617_v11, %v354_v47  ;;  %v40_v44 = vld [vmem:[%s1300_s1 + $0x80] sm:$0xff]  ;;  %v41_v45 = vld [vmem:[%s1300_s1 + $0x88] sm:$0xff] }
  0x1b   :  { %v420_v0 = vadd.f32 %v617_v11, %v355_v50  ;;  %v421_v1 = vadd.f32 %v617_v11, %v356_v51  ;;  %v422_v2 = vadd.f32 %v617_v11, %v357_v52  ;;  %v423_v3 = vadd.f32 %v617_v11, %v358_v53  ;;  %v42_v52 = vld [vmem:[%s1300_s1 + $0x90] sm:$0xff] }
  0x1c   :  { %481 = vst.msk [vmem:[%s1301_s2] sm:$0xff] %vm480_vm0, %v416_v57  ;;  %v101_v4 = vmul.f32 %v611_v8, %v32_v48  ;;  %v102_v5 = vmul.f32 %v611_v8, %v33_v49  ;;  %v103_v6 = vmul.f32 %v611_v8, %v34_v54  ;;  %v104_v7 = vmul.f32 %v611_v8, %v35_v55  ;;  %v45_v57 = vld [vmem:[%s1300_s1 + $0xa8] sm:$0xff] }
  0x1d   :  { %482 = vst.msk [vmem:[%s1301_s2 + $0x8] sm:$0xff] %vm480_vm0, %v417_v58  ;;  %v105_v12 = vmul.f32 %v611_v8, %v36_v56  ;;  %v106_v13 = vmul.f32 %v611_v8, %v37_v61  ;;  %v107_v14 = vmul.f32 %v611_v8, %v38_v62  ;;  %v108_v15 = vmul.f32 %v611_v8, %v39_v63  ;;  %v46_v58 = vld [vmem:[%s1300_s1 + $0xb0] sm:$0xff] }
  0x1e   :  { %483 = vst.msk [vmem:[%s1301_s2 + $0x10] sm:$0xff] %vm480_vm0, %v418_v59  ;;  %v166_v16 = vadd.f32 %v613_v9, %v101_v4  ;;  %v167_v17 = vadd.f32 %v613_v9, %v102_v5  ;;  %v168_v18 = vadd.f32 %v613_v9, %v103_v6  ;;  %v169_v19 = vadd.f32 %v613_v9, %v104_v7  ;;  %v47_v59 = vld [vmem:[%s1300_s1 + $0xb8] sm:$0xff] }
  0x1f   :  { %484 = vst.msk [vmem:[%s1301_s2 + $0x18] sm:$0xff] %vm480_vm0, %v419_v60  ;;  %v170_v20 = vadd.f32 %v613_v9, %v105_v12  ;;  %v171_v21 = vadd.f32 %v613_v9, %v106_v13  ;;  %v172_v22 = vadd.f32 %v613_v9, %v107_v14  ;;  %v173_v23 = vadd.f32 %v613_v9, %v108_v15 }
  0x20   :  { %485 = vst.msk [vmem:[%s1301_s2 + $0x20] sm:$0xff] %vm480_vm0, %v420_v0  ;;  %v230_v24 = vmul.f32 %v166_v16, %v32_v48  ;;  %v231_v25 = vmul.f32 %v167_v17, %v33_v49  ;;  %v232_v26 = vmul.f32 %v168_v18, %v34_v54  ;;  %v233_v27 = vmul.f32 %v169_v19, %v35_v55 }
  0x21   :  { %486 = vst.msk [vmem:[%s1301_s2 + $0x28] sm:$0xff] %vm480_vm0, %v421_v1  ;;  %v234_v28 = vmul.f32 %v170_v20, %v36_v56  ;;  %v235_v29 = vmul.f32 %v171_v21, %v37_v61  ;;  %v236_v30 = vmul.f32 %v172_v22, %v38_v62  ;;  %v237_v31 = vmul.f32 %v173_v23, %v39_v63 }
  0x22   :  { %487 = vst.msk [vmem:[%s1301_s2 + $0x30] sm:$0xff] %vm480_vm0, %v422_v2  ;;  %v295_v32 = vadd.f32 %v615_v10, %v230_v24  ;;  %v296_v33 = vadd.f32 %v615_v10, %v231_v25  ;;  %v297_v34 = vadd.f32 %v615_v10, %v232_v26  ;;  %v298_v35 = vadd.f32 %v615_v10, %v233_v27 }
  0x23   :  { %488 = vst.msk [vmem:[%s1301_s2 + $0x38] sm:$0xff] %vm480_vm0, %v423_v3  ;;  %v299_v36 = vadd.f32 %v615_v10, %v234_v28  ;;  %v300_v37 = vadd.f32 %v615_v10, %v235_v29  ;;  %v301_v38 = vadd.f32 %v615_v10, %v236_v30  ;;  %v302_v39 = vadd.f32 %v615_v10, %v237_v31 }
  0x24   :  { %v359_v40 = vmul.f32 %v295_v32, %v32_v48  ;;  %v360_v41 = vmul.f32 %v296_v33, %v33_v49  ;;  %v361_v42 = vmul.f32 %v297_v34, %v34_v54  ;;  %v362_v43 = vmul.f32 %v298_v35, %v35_v55  ;;  %v43_v48 = vld [vmem:[%s1300_s1 + $0x98] sm:$0xff]  ;;  %v44_v49 = vld [vmem:[%s1300_s1 + $0xa0] sm:$0xff] }
  0x25   :  { %v363_v46 = vmul.f32 %v299_v36, %v36_v56  ;;  %v364_v47 = vmul.f32 %v300_v37, %v37_v61  ;;  %v365_v50 = vmul.f32 %v301_v38, %v38_v62  ;;  %v366_v51 = vmul.f32 %v302_v39, %v39_v63 }
  0x26   :  { %v424_v53 = vadd.f32 %v617_v11, %v359_v40  ;;  %v425_v54 = vadd.f32 %v617_v11, %v360_v41  ;;  %v426_v55 = vadd.f32 %v617_v11, %v361_v42  ;;  %v427_v56 = vadd.f32 %v617_v11, %v362_v43  ;;  %v48_v40 = vld [vmem:[%s1300_s1 + $0xc0] sm:$0xff]  ;;  %v49_v41 = vld [vmem:[%s1300_s1 + $0xc8] sm:$0xff] }
  0x27   :  { %v428_v60 = vadd.f32 %v617_v11, %v363_v46  ;;  %v429_v61 = vadd.f32 %v617_v11, %v364_v47  ;;  %v430_v62 = vadd.f32 %v617_v11, %v365_v50  ;;  %v431_v63 = vadd.f32 %v617_v11, %v366_v51  ;;  %v50_v50 = vld [vmem:[%s1300_s1 + $0xd0] sm:$0xff] }
  0x28   :  { %489 = vst.msk [vmem:[%s1301_s2 + $0x40] sm:$0xff] %vm480_vm0, %v424_v53  ;;  %v109_v0 = vmul.f32 %v611_v8, %v40_v44  ;;  %v110_v1 = vmul.f32 %v611_v8, %v41_v45  ;;  %v111_v2 = vmul.f32 %v611_v8, %v42_v52  ;;  %v112_v3 = vmul.f32 %v611_v8, %v43_v48  ;;  %v53_v53 = vld [vmem:[%s1300_s1 + $0xe8] sm:$0xff] }
  0x29   :  { %490 = vst.msk [vmem:[%s1301_s2 + $0x48] sm:$0xff] %vm480_vm0, %v425_v54  ;;  %v113_v4 = vmul.f32 %v611_v8, %v44_v49  ;;  %v114_v5 = vmul.f32 %v611_v8, %v45_v57  ;;  %v115_v6 = vmul.f32 %v611_v8, %v46_v58  ;;  %v116_v7 = vmul.f32 %v611_v8, %v47_v59  ;;  %v54_v54 = vld [vmem:[%s1300_s1 + $0xf0] sm:$0xff] }
  0x2a   :  { %491 = vst.msk [vmem:[%s1301_s2 + $0x50] sm:$0xff] %vm480_vm0, %v426_v55  ;;  %v174_v12 = vadd.f32 %v613_v9, %v109_v0  ;;  %v175_v13 = vadd.f32 %v613_v9, %v110_v1  ;;  %v176_v14 = vadd.f32 %v613_v9, %v111_v2  ;;  %v177_v15 = vadd.f32 %v613_v9, %v112_v3  ;;  %v55_v55 = vld [vmem:[%s1300_s1 + $0xf8] sm:$0xff] }
  0x2b   :  { %492 = vst.msk [vmem:[%s1301_s2 + $0x58] sm:$0xff] %vm480_vm0, %v427_v56  ;;  %v178_v16 = vadd.f32 %v613_v9, %v113_v4  ;;  %v179_v17 = vadd.f32 %v613_v9, %v114_v5  ;;  %v180_v18 = vadd.f32 %v613_v9, %v115_v6  ;;  %v181_v19 = vadd.f32 %v613_v9, %v116_v7 }
  0x2c   :  { %493 = vst.msk [vmem:[%s1301_s2 + $0x60] sm:$0xff] %vm480_vm0, %v428_v60  ;;  %v238_v20 = vmul.f32 %v174_v12, %v40_v44  ;;  %v239_v21 = vmul.f32 %v175_v13, %v41_v45  ;;  %v240_v22 = vmul.f32 %v176_v14, %v42_v52  ;;  %v241_v23 = vmul.f32 %v177_v15, %v43_v48 }
  0x2d   :  { %494 = vst.msk [vmem:[%s1301_s2 + $0x68] sm:$0xff] %vm480_vm0, %v429_v61  ;;  %v242_v24 = vmul.f32 %v178_v16, %v44_v49  ;;  %v243_v25 = vmul.f32 %v179_v17, %v45_v57  ;;  %v244_v26 = vmul.f32 %v180_v18, %v46_v58  ;;  %v245_v27 = vmul.f32 %v181_v19, %v47_v59 }
  0x2e   :  { %495 = vst.msk [vmem:[%s1301_s2 + $0x70] sm:$0xff] %vm480_vm0, %v430_v62  ;;  %v303_v28 = vadd.f32 %v615_v10, %v238_v20  ;;  %v304_v29 = vadd.f32 %v615_v10, %v239_v21  ;;  %v305_v30 = vadd.f32 %v615_v10, %v240_v22  ;;  %v306_v31 = vadd.f32 %v615_v10, %v241_v23 }
  0x2f   :  { %496 = vst.msk [vmem:[%s1301_s2 + $0x78] sm:$0xff] %vm480_vm0, %v431_v63  ;;  %v307_v32 = vadd.f32 %v615_v10, %v242_v24  ;;  %v308_v33 = vadd.f32 %v615_v10, %v243_v25  ;;  %v309_v34 = vadd.f32 %v615_v10, %v244_v26  ;;  %v310_v35 = vadd.f32 %v615_v10, %v245_v27 }
  0x30   :  { %v367_v36 = vmul.f32 %v303_v28, %v40_v44  ;;  %v368_v37 = vmul.f32 %v304_v29, %v41_v45  ;;  %v369_v38 = vmul.f32 %v305_v30, %v42_v52  ;;  %v370_v39 = vmul.f32 %v306_v31, %v43_v48  ;;  %v51_v44 = vld [vmem:[%s1300_s1 + $0xd8] sm:$0xff]  ;;  %v52_v45 = vld [vmem:[%s1300_s1 + $0xe0] sm:$0xff] }
  0x31   :  { %v371_v42 = vmul.f32 %v307_v32, %v44_v49  ;;  %v372_v43 = vmul.f32 %v308_v33, %v45_v57  ;;  %v373_v46 = vmul.f32 %v309_v34, %v46_v58  ;;  %v374_v47 = vmul.f32 %v310_v35, %v47_v59 }
  0x32   :  { %v432_v51 = vadd.f32 %v617_v11, %v367_v36  ;;  %v433_v52 = vadd.f32 %v617_v11, %v368_v37  ;;  %v434_v48 = vadd.f32 %v617_v11, %v369_v38  ;;  %v435_v49 = vadd.f32 %v617_v11, %v370_v39  ;;  %v56_v36 = vld [vmem:[%s1300_s1 + $0x100] sm:$0xff]  ;;  %v57_v37 = vld [vmem:[%s1300_s1 + $0x108] sm:$0xff] }
  0x33   :  { %v436_v56 = vadd.f32 %v617_v11, %v371_v42  ;;  %v437_v57 = vadd.f32 %v617_v11, %v372_v43  ;;  %v438_v58 = vadd.f32 %v617_v11, %v373_v46  ;;  %v439_v59 = vadd.f32 %v617_v11, %v374_v47  ;;  %v58_v46 = vld [vmem:[%s1300_s1 + $0x110] sm:$0xff] }
  0x34   :  { %497 = vst.msk [vmem:[%s1301_s2 + $0x80] sm:$0xff] %vm480_vm0, %v432_v51  ;;  %v117_v60 = vmul.f32 %v611_v8, %v48_v40  ;;  %v118_v61 = vmul.f32 %v611_v8, %v49_v41  ;;  %v119_v62 = vmul.f32 %v611_v8, %v50_v50  ;;  %v120_v63 = vmul.f32 %v611_v8, %v51_v44  ;;  %v61_v51 = vld [vmem:[%s1300_s1 + $0x128] sm:$0xff] }
  0x35   :  { %498 = vst.msk [vmem:[%s1301_s2 + $0x88] sm:$0xff] %vm480_vm0, %v433_v52  ;;  %v121_v0 = vmul.f32 %v611_v8, %v52_v45  ;;  %v122_v1 = vmul.f32 %v611_v8, %v53_v53  ;;  %v123_v2 = vmul.f32 %v611_v8, %v54_v54  ;;  %v124_v3 = vmul.f32 %v611_v8, %v55_v55  ;;  %v62_v52 = vld [vmem:[%s1300_s1 + $0x130] sm:$0xff] }
  0x36   :  { %499 = vst.msk [vmem:[%s1301_s2 + $0x90] sm:$0xff] %vm480_vm0, %v434_v48  ;;  %v182_v4 = vadd.f32 %v613_v9, %v117_v60  ;;  %v183_v5 = vadd.f32 %v613_v9, %v118_v61  ;;  %v184_v6 = vadd.f32 %v613_v9, %v119_v62  ;;  %v185_v7 = vadd.f32 %v613_v9, %v120_v63  ;;  %v63_v48 = vld [vmem:[%s1300_s1 + $0x138] sm:$0xff] }
  0x37   :  { %500 = vst.msk [vmem:[%s1301_s2 + $0x98] sm:$0xff] %vm480_vm0, %v435_v49  ;;  %v186_v12 = vadd.f32 %v613_v9, %v121_v0  ;;  %v187_v13 = vadd.f32 %v613_v9, %v122_v1  ;;  %v188_v14 = vadd.f32 %v613_v9, %v123_v2  ;;  %v189_v15 = vadd.f32 %v613_v9, %v124_v3 }
  0x38   :  { %501 = vst.msk [vmem:[%s1301_s2 + $0xa0] sm:$0xff] %vm480_vm0, %v436_v56  ;;  %v246_v16 = vmul.f32 %v182_v4, %v48_v40  ;;  %v247_v17 = vmul.f32 %v183_v5, %v49_v41  ;;  %v248_v18 = vmul.f32 %v184_v6, %v50_v50  ;;  %v249_v19 = vmul.f32 %v185_v7, %v51_v44 }
  0x39   :  { %502 = vst.msk [vmem:[%s1301_s2 + $0xa8] sm:$0xff] %vm480_vm0, %v437_v57  ;;  %v250_v20 = vmul.f32 %v186_v12, %v52_v45  ;;  %v251_v21 = vmul.f32 %v187_v13, %v53_v53  ;;  %v252_v22 = vmul.f32 %v188_v14, %v54_v54  ;;  %v253_v23 = vmul.f32 %v189_v15, %v55_v55 }
  0x3a   :  { %503 = vst.msk [vmem:[%s1301_s2 + $0xb0] sm:$0xff] %vm480_vm0, %v438_v58  ;;  %v311_v24 = vadd.f32 %v615_v10, %v246_v16  ;;  %v312_v25 = vadd.f32 %v615_v10, %v247_v17  ;;  %v313_v26 = vadd.f32 %v615_v10, %v248_v18  ;;  %v314_v27 = vadd.f32 %v615_v10, %v249_v19 }
  0x3b   :  { %504 = vst.msk [vmem:[%s1301_s2 + $0xb8] sm:$0xff] %vm480_vm0, %v439_v59  ;;  %v315_v28 = vadd.f32 %v615_v10, %v250_v20  ;;  %v316_v29 = vadd.f32 %v615_v10, %v251_v21  ;;  %v317_v30 = vadd.f32 %v615_v10, %v252_v22  ;;  %v318_v31 = vadd.f32 %v615_v10, %v253_v23 }
  0x3c   :  { %v375_v32 = vmul.f32 %v311_v24, %v48_v40  ;;  %v376_v33 = vmul.f32 %v312_v25, %v49_v41  ;;  %v377_v34 = vmul.f32 %v313_v26, %v50_v50  ;;  %v378_v35 = vmul.f32 %v314_v27, %v51_v44  ;;  %v59_v40 = vld [vmem:[%s1300_s1 + $0x118] sm:$0xff]  ;;  %v60_v41 = vld [vmem:[%s1300_s1 + $0x120] sm:$0xff] }
  0x3d   :  { %v379_v38 = vmul.f32 %v315_v28, %v52_v45  ;;  %v380_v39 = vmul.f32 %v316_v29, %v53_v53  ;;  %v381_v42 = vmul.f32 %v317_v30, %v54_v54  ;;  %v382_v43 = vmul.f32 %v318_v31, %v55_v55 }
  0x3e   :  { %v440_v47 = vadd.f32 %v617_v11, %v375_v32  ;;  %v441_v50 = vadd.f32 %v617_v11, %v376_v33  ;;  %v442_v44 = vadd.f32 %v617_v11, %v377_v34  ;;  %v443_v45 = vadd.f32 %v617_v11, %v378_v35  ;;  %v64_v32 = vld [vmem:[%s1300_s1 + $0x140] sm:$0xff]  ;;  %v65_v33 = vld [vmem:[%s1300_s1 + $0x148] sm:$0xff] }
  0x3f   :  { %v444_v49 = vadd.f32 %v617_v11, %v379_v38  ;;  %v445_v53 = vadd.f32 %v617_v11, %v380_v39  ;;  %v446_v54 = vadd.f32 %v617_v11, %v381_v42  ;;  %v447_v55 = vadd.f32 %v617_v11, %v382_v43  ;;  %v66_v42 = vld [vmem:[%s1300_s1 + $0x150] sm:$0xff] }
  0x40   :  { %505 = vst.msk [vmem:[%s1301_s2 + $0xc0] sm:$0xff] %vm480_vm0, %v440_v47  ;;  %v125_v56 = vmul.f32 %v611_v8, %v56_v36  ;;  %v126_v57 = vmul.f32 %v611_v8, %v57_v37  ;;  %v127_v58 = vmul.f32 %v611_v8, %v58_v46  ;;  %v128_v59 = vmul.f32 %v611_v8, %v59_v40  ;;  %v69_v47 = vld [vmem:[%s1300_s1 + $0x168] sm:$0xff] }
  0x41   :  { %506 = vst.msk [vmem:[%s1301_s2 + $0xc8] sm:$0xff] %vm480_vm0, %v441_v50  ;;  %v129_v60 = vmul.f32 %v611_v8, %v60_v41  ;;  %v130_v61 = vmul.f32 %v611_v8, %v61_v51  ;;  %v131_v62 = vmul.f32 %v611_v8, %v62_v52  ;;  %v132_v63 = vmul.f32 %v611_v8, %v63_v48  ;;  %v70_v50 = vld [vmem:[%s1300_s1 + $0x170] sm:$0xff] }
  0x42   :  { %507 = vst.msk [vmem:[%s1301_s2 + $0xd0] sm:$0xff] %vm480_vm0, %v442_v44  ;;  %v190_v0 = vadd.f32 %v613_v9, %v125_v56  ;;  %v191_v1 = vadd.f32 %v613_v9, %v126_v57  ;;  %v192_v2 = vadd.f32 %v613_v9, %v127_v58  ;;  %v193_v3 = vadd.f32 %v613_v9, %v128_v59  ;;  %v71_v44 = vld [vmem:[%s1300_s1 + $0x178] sm:$0xff] }
  0x43   :  { %508 = vst.msk [vmem:[%s1301_s2 + $0xd8] sm:$0xff] %vm480_vm0, %v443_v45  ;;  %v194_v4 = vadd.f32 %v613_v9, %v129_v60  ;;  %v195_v5 = vadd.f32 %v613_v9, %v130_v61  ;;  %v196_v6 = vadd.f32 %v613_v9, %v131_v62  ;;  %v197_v7 = vadd.f32 %v613_v9, %v132_v63 }
  0x44   :  { %509 = vst.msk [vmem:[%s1301_s2 + $0xe0] sm:$0xff] %vm480_vm0, %v444_v49  ;;  %v254_v12 = vmul.f32 %v190_v0, %v56_v36  ;;  %v255_v13 = vmul.f32 %v191_v1, %v57_v37  ;;  %v256_v14 = vmul.f32 %v192_v2, %v58_v46  ;;  %v257_v15 = vmul.f32 %v193_v3, %v59_v40 }
  0x45   :  { %510 = vst.msk [vmem:[%s1301_s2 + $0xe8] sm:$0xff] %vm480_vm0, %v445_v53  ;;  %v258_v16 = vmul.f32 %v194_v4, %v60_v41  ;;  %v259_v17 = vmul.f32 %v195_v5, %v61_v51  ;;  %v260_v18 = vmul.f32 %v196_v6, %v62_v52  ;;  %v261_v19 = vmul.f32 %v197_v7, %v63_v48 }
  0x46   :  { %511 = vst.msk [vmem:[%s1301_s2 + $0xf0] sm:$0xff] %vm480_vm0, %v446_v54  ;;  %v319_v20 = vadd.f32 %v615_v10, %v254_v12  ;;  %v320_v21 = vadd.f32 %v615_v10, %v255_v13  ;;  %v321_v22 = vadd.f32 %v615_v10, %v256_v14  ;;  %v322_v23 = vadd.f32 %v615_v10, %v257_v15 }
  0x47   :  { %512 = vst.msk [vmem:[%s1301_s2 + $0xf8] sm:$0xff] %vm480_vm0, %v447_v55  ;;  %v323_v24 = vadd.f32 %v615_v10, %v258_v16  ;;  %v324_v25 = vadd.f32 %v615_v10, %v259_v17  ;;  %v325_v26 = vadd.f32 %v615_v10, %v260_v18  ;;  %v326_v27 = vadd.f32 %v615_v10, %v261_v19 }
  0x48   :  { %v383_v28 = vmul.f32 %v319_v20, %v56_v36  ;;  %v384_v29 = vmul.f32 %v320_v21, %v57_v37  ;;  %v385_v30 = vmul.f32 %v321_v22, %v58_v46  ;;  %v386_v31 = vmul.f32 %v322_v23, %v59_v40  ;;  %v67_v36 = vld [vmem:[%s1300_s1 + $0x158] sm:$0xff]  ;;  %v68_v37 = vld [vmem:[%s1300_s1 + $0x160] sm:$0xff] }
  0x49   :  { %v387_v34 = vmul.f32 %v323_v24, %v60_v41  ;;  %v388_v35 = vmul.f32 %v324_v25, %v61_v51  ;;  %v389_v38 = vmul.f32 %v325_v26, %v62_v52  ;;  %v390_v39 = vmul.f32 %v326_v27, %v63_v48 }
  0x4a   :  { %v448_v43 = vadd.f32 %v617_v11, %v383_v28  ;;  %v449_v46 = vadd.f32 %v617_v11, %v384_v29  ;;  %v450_v40 = vadd.f32 %v617_v11, %v385_v30  ;;  %v451_v41 = vadd.f32 %v617_v11, %v386_v31  ;;  %v72_v28 = vld [vmem:[%s1300_s1 + $0x180] sm:$0xff]  ;;  %v73_v29 = vld [vmem:[%s1300_s1 + $0x188] sm:$0xff] }
  0x4b   :  { %v452_v45 = vadd.f32 %v617_v11, %v387_v34  ;;  %v453_v51 = vadd.f32 %v617_v11, %v388_v35  ;;  %v454_v52 = vadd.f32 %v617_v11, %v389_v38  ;;  %v455_v48 = vadd.f32 %v617_v11, %v390_v39  ;;  %v74_v38 = vld [vmem:[%s1300_s1 + $0x190] sm:$0xff] }
  0x4c   :  { %513 = vst.msk [vmem:[%s1301_s2 + $0x100] sm:$0xff] %vm480_vm0, %v448_v43  ;;  %v133_v49 = vmul.f32 %v611_v8, %v64_v32  ;;  %v134_v53 = vmul.f32 %v611_v8, %v65_v33  ;;  %v135_v54 = vmul.f32 %v611_v8, %v66_v42  ;;  %v136_v55 = vmul.f32 %v611_v8, %v67_v36  ;;  %v77_v43 = vld [vmem:[%s1300_s1 + $0x1a8] sm:$0xff] }
  0x4d   :  { %514 = vst.msk [vmem:[%s1301_s2 + $0x108] sm:$0xff] %vm480_vm0, %v449_v46  ;;  %v137_v56 = vmul.f32 %v611_v8, %v68_v37  ;;  %v138_v57 = vmul.f32 %v611_v8, %v69_v47  ;;  %v139_v58 = vmul.f32 %v611_v8, %v70_v50  ;;  %v140_v59 = vmul.f32 %v611_v8, %v71_v44  ;;  %v78_v46 = vld [vmem:[%s1300_s1 + $0x1b0] sm:$0xff] }
  0x4e   :  { %515 = vst.msk [vmem:[%s1301_s2 + $0x110] sm:$0xff] %vm480_vm0, %v450_v40  ;;  %v198_v60 = vadd.f32 %v613_v9, %v133_v49  ;;  %v199_v61 = vadd.f32 %v613_v9, %v134_v53  ;;  %v200_v62 = vadd.f32 %v613_v9, %v135_v54  ;;  %v201_v63 = vadd.f32 %v613_v9, %v136_v55  ;;  %v79_v40 = vld [vmem:[%s1300_s1 + $0x1b8] sm:$0xff] }
  0x4f   :  { %516 = vst.msk [vmem:[%s1301_s2 + $0x118] sm:$0xff] %vm480_vm0, %v451_v41  ;;  %v202_v0 = vadd.f32 %v613_v9, %v137_v56  ;;  %v203_v1 = vadd.f32 %v613_v9, %v138_v57  ;;  %v204_v2 = vadd.f32 %v613_v9, %v139_v58  ;;  %v205_v3 = vadd.f32 %v613_v9, %v140_v59 }
  0x50   :  { %517 = vst.msk [vmem:[%s1301_s2 + $0x120] sm:$0xff] %vm480_vm0, %v452_v45  ;;  %v262_v4 = vmul.f32 %v198_v60, %v64_v32  ;;  %v263_v5 = vmul.f32 %v199_v61, %v65_v33  ;;  %v264_v6 = vmul.f32 %v200_v62, %v66_v42  ;;  %v265_v7 = vmul.f32 %v201_v63, %v67_v36 }
  0x51   :  { %518 = vst.msk [vmem:[%s1301_s2 + $0x128] sm:$0xff] %vm480_vm0, %v453_v51  ;;  %v266_v12 = vmul.f32 %v202_v0, %v68_v37  ;;  %v267_v13 = vmul.f32 %v203_v1, %v69_v47  ;;  %v268_v14 = vmul.f32 %v204_v2, %v70_v50  ;;  %v269_v15 = vmul.f32 %v205_v3, %v71_v44 }
  0x52   :  { %519 = vst.msk [vmem:[%s1301_s2 + $0x130] sm:$0xff] %vm480_vm0, %v454_v52  ;;  %v327_v16 = vadd.f32 %v615_v10, %v262_v4  ;;  %v328_v17 = vadd.f32 %v615_v10, %v263_v5  ;;  %v329_v18 = vadd.f32 %v615_v10, %v264_v6  ;;  %v330_v19 = vadd.f32 %v615_v10, %v265_v7 }
  0x53   :  { %520 = vst.msk [vmem:[%s1301_s2 + $0x138] sm:$0xff] %vm480_vm0, %v455_v48  ;;  %v331_v20 = vadd.f32 %v615_v10, %v266_v12  ;;  %v332_v21 = vadd.f32 %v615_v10, %v267_v13  ;;  %v333_v22 = vadd.f32 %v615_v10, %v268_v14  ;;  %v334_v23 = vadd.f32 %v615_v10, %v269_v15 }
  0x54   :  { %v391_v24 = vmul.f32 %v327_v16, %v64_v32  ;;  %v392_v25 = vmul.f32 %v328_v17, %v65_v33  ;;  %v393_v26 = vmul.f32 %v329_v18, %v66_v42  ;;  %v394_v27 = vmul.f32 %v330_v19, %v67_v36  ;;  %v75_v32 = vld [vmem:[%s1300_s1 + $0x198] sm:$0xff]  ;;  %v76_v33 = vld [vmem:[%s1300_s1 + $0x1a0] sm:$0xff] }
  0x55   :  { %v395_v30 = vmul.f32 %v331_v20, %v68_v37  ;;  %v396_v31 = vmul.f32 %v332_v21, %v69_v47  ;;  %v397_v34 = vmul.f32 %v333_v22, %v70_v50  ;;  %v398_v35 = vmul.f32 %v334_v23, %v71_v44 }
  0x56   :  { %v456_v39 = vadd.f32 %v617_v11, %v391_v24  ;;  %v457_v42 = vadd.f32 %v617_v11, %v392_v25  ;;  %v458_v36 = vadd.f32 %v617_v11, %v393_v26  ;;  %v459_v37 = vadd.f32 %v617_v11, %v394_v27  ;;  %v80_v24 = vld [vmem:[%s1300_s1 + $0x1c0] sm:$0xff]  ;;  %v81_v25 = vld [vmem:[%s1300_s1 + $0x1c8] sm:$0xff] }
  0x57   :  { %v460_v41 = vadd.f32 %v617_v11, %v395_v30  ;;  %v461_v47 = vadd.f32 %v617_v11, %v396_v31  ;;  %v462_v50 = vadd.f32 %v617_v11, %v397_v34  ;;  %v463_v44 = vadd.f32 %v617_v11, %v398_v35  ;;  %v82_v34 = vld [vmem:[%s1300_s1 + $0x1d0] sm:$0xff] }
  0x58   :  { %521 = vst.msk [vmem:[%s1301_s2 + $0x140] sm:$0xff] %vm480_vm0, %v456_v39  ;;  %v141_v45 = vmul.f32 %v611_v8, %v72_v28  ;;  %v142_v51 = vmul.f32 %v611_v8, %v73_v29  ;;  %v143_v52 = vmul.f32 %v611_v8, %v74_v38  ;;  %v144_v48 = vmul.f32 %v611_v8, %v75_v32  ;;  %v85_v39 = vld [vmem:[%s1300_s1 + $0x1e8] sm:$0xff] }
  0x59   :  { %522 = vst.msk [vmem:[%s1301_s2 + $0x148] sm:$0xff] %vm480_vm0, %v457_v42  ;;  %v145_v49 = vmul.f32 %v611_v8, %v76_v33  ;;  %v146_v53 = vmul.f32 %v611_v8, %v77_v43  ;;  %v147_v54 = vmul.f32 %v611_v8, %v78_v46  ;;  %v148_v55 = vmul.f32 %v611_v8, %v79_v40  ;;  %v86_v42 = vld [vmem:[%s1300_s1 + $0x1f0] sm:$0xff] }
  0x5a   :  { %523 = vst.msk [vmem:[%s1301_s2 + $0x150] sm:$0xff] %vm480_vm0, %v458_v36  ;;  %v206_v56 = vadd.f32 %v613_v9, %v141_v45  ;;  %v207_v57 = vadd.f32 %v613_v9, %v142_v51  ;;  %v208_v58 = vadd.f32 %v613_v9, %v143_v52  ;;  %v209_v59 = vadd.f32 %v613_v9, %v144_v48  ;;  %v87_v36 = vld [vmem:[%s1300_s1 + $0x1f8] sm:$0xff] }
  0x5b   :  { %524 = vst.msk [vmem:[%s1301_s2 + $0x158] sm:$0xff] %vm480_vm0, %v459_v37  ;;  %v210_v60 = vadd.f32 %v613_v9, %v145_v49  ;;  %v211_v61 = vadd.f32 %v613_v9, %v146_v53  ;;  %v212_v62 = vadd.f32 %v613_v9, %v147_v54  ;;  %v213_v63 = vadd.f32 %v613_v9, %v148_v55 }
  0x5c   :  { %525 = vst.msk [vmem:[%s1301_s2 + $0x160] sm:$0xff] %vm480_vm0, %v460_v41  ;;  %v270_v0 = vmul.f32 %v206_v56, %v72_v28  ;;  %v271_v1 = vmul.f32 %v207_v57, %v73_v29  ;;  %v272_v2 = vmul.f32 %v208_v58, %v74_v38  ;;  %v273_v3 = vmul.f32 %v209_v59, %v75_v32 }
  0x5d   :  { %526 = vst.msk [vmem:[%s1301_s2 + $0x168] sm:$0xff] %vm480_vm0, %v461_v47  ;;  %v274_v4 = vmul.f32 %v210_v60, %v76_v33  ;;  %v275_v5 = vmul.f32 %v211_v61, %v77_v43  ;;  %v276_v6 = vmul.f32 %v212_v62, %v78_v46  ;;  %v277_v7 = vmul.f32 %v213_v63, %v79_v40 }
  0x5e   :  { %527 = vst.msk [vmem:[%s1301_s2 + $0x170] sm:$0xff] %vm480_vm0, %v462_v50  ;;  %v335_v12 = vadd.f32 %v615_v10, %v270_v0  ;;  %v336_v13 = vadd.f32 %v615_v10, %v271_v1  ;;  %v337_v14 = vadd.f32 %v615_v10, %v272_v2  ;;  %v338_v15 = vadd.f32 %v615_v10, %v273_v3 }
  0x5f   :  { %528 = vst.msk [vmem:[%s1301_s2 + $0x178] sm:$0xff] %vm480_vm0, %v463_v44  ;;  %v339_v16 = vadd.f32 %v615_v10, %v274_v4  ;;  %v340_v17 = vadd.f32 %v615_v10, %v275_v5  ;;  %v341_v18 = vadd.f32 %v615_v10, %v276_v6  ;;  %v342_v19 = vadd.f32 %v615_v10, %v277_v7 }
  0x60   :  { %v399_v20 = vmul.f32 %v335_v12, %v72_v28  ;;  %v400_v21 = vmul.f32 %v336_v13, %v73_v29  ;;  %v401_v22 = vmul.f32 %v337_v14, %v74_v38  ;;  %v402_v23 = vmul.f32 %v338_v15, %v75_v32  ;;  %v83_v28 = vld [vmem:[%s1300_s1 + $0x1d8] sm:$0xff]  ;;  %v84_v29 = vld [vmem:[%s1300_s1 + $0x1e0] sm:$0xff] }
  0x61   :  { %v403_v26 = vmul.f32 %v339_v16, %v76_v33  ;;  %v404_v27 = vmul.f32 %v340_v17, %v77_v43  ;;  %v405_v30 = vmul.f32 %v341_v18, %v78_v46  ;;  %v406_v31 = vmul.f32 %v342_v19, %v79_v40 }
  0x62   :  { %v464_v35 = vadd.f32 %v617_v11, %v399_v20  ;;  %v465_v38 = vadd.f32 %v617_v11, %v400_v21  ;;  %v466_v32 = vadd.f32 %v617_v11, %v401_v22  ;;  %v467_v33 = vadd.f32 %v617_v11, %v402_v23 }
  0x63   :  { %v468_v37 = vadd.f32 %v617_v11, %v403_v26  ;;  %v469_v43 = vadd.f32 %v617_v11, %v404_v27  ;;  %v470_v46 = vadd.f32 %v617_v11, %v405_v30  ;;  %v471_v40 = vadd.f32 %v617_v11, %v406_v31 }
  0x64   :  { %529 = vst.msk [vmem:[%s1301_s2 + $0x180] sm:$0xff] %vm480_vm0, %v464_v35  ;;  %v149_v41 = vmul.f32 %v611_v8, %v80_v24  ;;  %v150_v47 = vmul.f32 %v611_v8, %v81_v25  ;;  %v151_v50 = vmul.f32 %v611_v8, %v82_v34  ;;  %v152_v44 = vmul.f32 %v611_v8, %v83_v28 }
  0x65   :  { %530 = vst.msk [vmem:[%s1301_s2 + $0x188] sm:$0xff] %vm480_vm0, %v465_v38  ;;  %v153_v45 = vmul.f32 %v611_v8, %v84_v29  ;;  %v154_v51 = vmul.f32 %v611_v8, %v85_v39  ;;  %v155_v52 = vmul.f32 %v611_v8, %v86_v42  ;;  %v156_v48 = vmul.f32 %v611_v8, %v87_v36 }
  0x66   :  { %531 = vst.msk [vmem:[%s1301_s2 + $0x190] sm:$0xff] %vm480_vm0, %v466_v32  ;;  %v214_v49 = vadd.f32 %v613_v9, %v149_v41  ;;  %v215_v53 = vadd.f32 %v613_v9, %v150_v47  ;;  %v216_v54 = vadd.f32 %v613_v9, %v151_v50  ;;  %v217_v55 = vadd.f32 %v613_v9, %v152_v44 }
  0x67   :  { %532 = vst.msk [vmem:[%s1301_s2 + $0x198] sm:$0xff] %vm480_vm0, %v467_v33  ;;  %v218_v8 = vadd.f32 %v613_v9, %v153_v45  ;;  %v219_v56 = vadd.f32 %v613_v9, %v154_v51  ;;  %v220_v57 = vadd.f32 %v613_v9, %v155_v52  ;;  %v221_v58 = vadd.f32 %v613_v9, %v156_v48 }
  0x68   :  { %533 = vst.msk [vmem:[%s1301_s2 + $0x1a0] sm:$0xff] %vm480_vm0, %v468_v37  ;;  %v278_v59 = vmul.f32 %v214_v49, %v80_v24  ;;  %v279_v60 = vmul.f32 %v215_v53, %v81_v25  ;;  %v280_v61 = vmul.f32 %v216_v54, %v82_v34  ;;  %v281_v62 = vmul.f32 %v217_v55, %v83_v28 }
  0x69   :  { %534 = vst.msk [vmem:[%s1301_s2 + $0x1a8] sm:$0xff] %vm480_vm0, %v469_v43  ;;  %v282_v63 = vmul.f32 %v218_v8, %v84_v29  ;;  %v283_v0 = vmul.f32 %v219_v56, %v85_v39  ;;  %v284_v1 = vmul.f32 %v220_v57, %v86_v42  ;;  %v285_v2 = vmul.f32 %v221_v58, %v87_v36 }
  0x6a   :  { %535 = vst.msk [vmem:[%s1301_s2 + $0x1b0] sm:$0xff] %vm480_vm0, %v470_v46  ;;  %v343_v9 = vadd.f32 %v615_v10, %v278_v59  ;;  %v344_v3 = vadd.f32 %v615_v10, %v279_v60  ;;  %v345_v4 = vadd.f32 %v615_v10, %v280_v61  ;;  %v346_v5 = vadd.f32 %v615_v10, %v281_v62 }
  0x6b   :  { %536 = vst.msk [vmem:[%s1301_s2 + $0x1b8] sm:$0xff] %vm480_vm0, %v471_v40  ;;  %v347_v6 = vadd.f32 %v615_v10, %v282_v63  ;;  %v348_v7 = vadd.f32 %v615_v10, %v283_v0  ;;  %v349_v12 = vadd.f32 %v615_v10, %v284_v1  ;;  %v350_v13 = vadd.f32 %v615_v10, %v285_v2 }
  0x6c   :  { %v407_v14 = vmul.f32 %v343_v9, %v80_v24  ;;  %v408_v15 = vmul.f32 %v344_v3, %v81_v25  ;;  %v409_v16 = vmul.f32 %v345_v4, %v82_v34  ;;  %v410_v17 = vmul.f32 %v346_v5, %v83_v28 }
  0x6d   :  { %v411_v18 = vmul.f32 %v347_v6, %v84_v29  ;;  %v412_v19 = vmul.f32 %v348_v7, %v85_v39  ;;  %v413_v23 = vmul.f32 %v349_v12, %v86_v42  ;;  %v414_v27 = vmul.f32 %v350_v13, %v87_v36 }
  0x6e   :  { %v472_v20 = vadd.f32 %v617_v11, %v407_v14  ;;  %v473_v21 = vadd.f32 %v617_v11, %v408_v15  ;;  %v474_v22 = vadd.f32 %v617_v11, %v409_v16  ;;  %v475_v26 = vadd.f32 %v617_v11, %v410_v17 }
  0x6f   :  { %v476_v10 = vadd.f32 %v617_v11, %v411_v18  ;;  %v477_v24 = vadd.f32 %v617_v11, %v412_v19  ;;  %v478_v25 = vadd.f32 %v617_v11, %v413_v23  ;;  %v479_v30 = vadd.f32 %v617_v11, %v414_v27 }
  0x70   :  { %537 = vst.msk [vmem:[%s1301_s2 + $0x1c0] sm:$0xff] %vm480_vm0, %v472_v20 }
  0x71   :  { %538 = vst.msk [vmem:[%s1301_s2 + $0x1c8] sm:$0xff] %vm480_vm0, %v473_v21 }
  0x72   :  { %539 = vst.msk [vmem:[%s1301_s2 + $0x1d0] sm:$0xff] %vm480_vm0, %v474_v22 }
  0x73   :  { %540 = vst.msk [vmem:[%s1301_s2 + $0x1d8] sm:$0xff] %vm480_vm0, %v475_v26 }
  0x74   :  { %541 = vst.msk [vmem:[%s1301_s2 + $0x1e0] sm:$0xff] %vm480_vm0, %v476_v10 }
  0x75   :  { %542 = vst.msk [vmem:[%s1301_s2 + $0x1e8] sm:$0xff] %vm480_vm0, %v477_v24 }
  0x76   :  { %543 = vst.msk [vmem:[%s1301_s2 + $0x1f0] sm:$0xff] %vm480_vm0, %v478_v25 }
  0x77   :  { %544 = vst.msk [vmem:[%s1301_s2 + $0x1f8] sm:$0xff] %vm480_vm0, %v479_v30 }
  0x78   :  { %549 = vsyncpa [#allocation3], 1 }

</bundles_post_ra>
